<compile_context>
chip_gen: v5e
topology: v5e:2x2
jax: 0.10.0
libtpu: 0.0.40
codegen_flags: <defaults>
</compile_context>

<pallas_src>
import functools

import jax
import jax.numpy as jnp
from jax.experimental import pallas as pl
from jax.experimental.pallas import tpu as pltpu


def _affine_tanh_kernel(x_ref, gamma_ref, beta_ref, o_ref):
    # x_ref:     (TN, TF) VMEM tile, lane-dense along the flattened C*H*W axis.
    # gamma_ref: (1, TF)  f32 per-element scale row (resident / re-used per j).
    # beta_ref:  (1, TF)  f32 per-element shift row.
    # Compute in f32, cast only at the store.
    x = x_ref[...].astype(jnp.float32)
    y = jnp.tanh(x * gamma_ref[...] + beta_ref[...])
    o_ref[...] = y.astype(o_ref.dtype)


def _derive_tiles(N, F, itemsize, tile_n, tile_f):
    # ~4 MiB per x tile -> with in+out double buffering ~16 MiB of VMEM plus
    # tiny resident gamma/beta rows; explicit 48 MiB limit covers it on every
    # generation (v7x physical VMEM = 64 MiB).
    target_tile_bytes = 4 * 1024 * 1024
    if tile_f is None:
        row_bytes = F * itemsize
        if row_bytes <= target_tile_bytes:
            tile_f = F
        else:
            # One sample's slab exceeds the budget: tile the feature axis too
            # (lane-aligned), keeping the DMA pipeline deep for any shape.
            tile_f = max(128, (target_tile_bytes // itemsize) // 128 * 128)
    if tile_n is None:
        tile_bytes_per_row = tile_f * itemsize
        tile_n = max(1, target_tile_bytes // max(tile_bytes_per_row, 1))
        tile_n = min(tile_n, N)
        if N >= 8:
            tile_n = max(8, (tile_n // 8) * 8)   # sublane-aligned
        else:
            tile_n = N                           # equals full dim -> allowed
    # Occupancy nudge: on v7x both TensorCores only engage if the parallel
    # grid has >= 2 steps; split the tile when the problem is big enough.
    if (pl.cdiv(N, tile_n) * pl.cdiv(F, tile_f) == 1
            and N * F * itemsize >= 2 * 1024 * 1024):
        if N >= 16:
            tile_n = max(8, ((tile_n // 2) // 8) * 8)
        elif F >= 256 and tile_f >= 256:
            tile_f = max(128, ((tile_f // 2) // 128) * 128)
    return int(tile_n), int(tile_f)


def _apply_f(x_nchw, gamma, beta, tile_n=None, tile_f=None):
    """f(x) = tanh(gamma[c] * x + beta[c]) on a lane-dense 2-D view of x."""
    N, C, H, W = x_nchw.shape
    HW = H * W
    F = C * HW
    x2 = x_nchw.reshape(N, F)                               # no data movement
    # Per-channel params expanded once to lane width (N-independent, tiny).
    g_row = jnp.repeat(gamma.astype(jnp.float32), HW).reshape(1, F)
    b_row = jnp.repeat(beta.astype(jnp.float32), HW).reshape(1, F)

    tile_n, tile_f = _derive_tiles(N, F, x2.dtype.itemsize, tile_n, tile_f)
    grid = (pl.cdiv(N, tile_n), pl.cdiv(F, tile_f))

    out2 = pl.pallas_call(
        _affine_tanh_kernel,
        out_shape=jax.ShapeDtypeStruct((N, F), x2.dtype),
        grid=grid,
        in_specs=[
            pl.BlockSpec((tile_n, tile_f), lambda i, j: (i, j)),
            pl.BlockSpec((1, tile_f), lambda i, j: (0, j)),
            pl.BlockSpec((1, tile_f), lambda i, j: (0, j)),
        ],
        out_specs=pl.BlockSpec((tile_n, tile_f), lambda i, j: (i, j)),
        compiler_params=pltpu.CompilerParams(
            dimension_semantics=("parallel", "parallel"),
            vmem_limit_bytes=48 * 1024 * 1024),
    )(x2, g_row, b_row)
    return out2.reshape(N, C, H, W)


def _prob_transform_impl(x_nchw, gamma, beta, flag, tile_n=None, tile_f=None):
    """ProbTransform.forward: flag==1 -> f(x) via the Pallas kernel, else x.

    The branch is a wrapper-level lax.cond, so the identity path does no
    kernel DMA/compute at all.
    """
    return jax.lax.cond(
        flag[0] == 1,
        lambda x: _apply_f(x, gamma, beta, tile_n, tile_f),
        lambda x: x,
        x_nchw,
    )


prob_transform = jax.jit(_prob_transform_impl,
                         static_argnames=("tile_n", "tile_f"))
# Donating variant: lets XLA alias x into the output so the flag==0 (p-miss)
# path is a true no-op (no HBM copy).  Only use when the caller does not
# reuse x afterwards.
prob_transform_donate = jax.jit(_prob_transform_impl, donate_argnums=(0,),
                                static_argnames=("tile_n", "tile_f"))


if __name__ == "__main__":
    key = jax.random.PRNGKey(0)
    k_x, k_p = jax.random.split(key)

    N, C, H, W = 2, 4, 16, 16
    x = jax.random.normal(k_x, (N, C, H, W), dtype=jnp.float32)

    # Deterministic "parameters" of the synthetic f (per-channel affine + tanh).
    gamma = jnp.linspace(0.5, 2.0, C, dtype=jnp.float32)
    beta = jnp.linspace(-0.25, 0.25, C, dtype=jnp.float32)

    # ProbTransform(f, p=1): `random.random() < p` replicated with a JAX draw.
    p = 1.0
    u = jax.random.uniform(k_p, ())
    flag = (u < p).astype(jnp.int32).reshape(1)

    # tile_f=512 forces a 2-step feature grid even at this tiny shape so the
    # pipelined / multi-block path is actually exercised (F = C*H*W = 1024).
    out = prob_transform(x, gamma, beta, flag, tile_f=512)
    out = jax.block_until_ready(out)

    # Reference check (pure JAX), flag == 1 path.
    f_x = jnp.tanh(x * gamma.reshape(1, C, 1, 1) + beta.reshape(1, C, 1, 1))
    ref = jnp.where(flag[0] == 1, f_x, x)
    assert out.shape == (N, C, H, W)
    assert jnp.allclose(out, ref, atol=1e-6), "mismatch vs reference (flag=1)"

    # flag == 0 path: must return x bit-identically with no kernel work.
    flag0 = jnp.zeros((1,), dtype=jnp.int32)
    out0 = jax.block_until_ready(prob_transform(x, gamma, beta, flag0, tile_f=512))
    assert jnp.array_equal(out0, x), "mismatch vs reference (flag=0)"

    # flag == 0 path with donation: input buffer may be aliased into the
    # output, making the p-miss branch free.  Use a fresh copy since donation
    # invalidates the argument.
    x_copy = jnp.array(x)
    out0_d = jax.block_until_ready(
        prob_transform_donate(x_copy, gamma, beta, flag0, tile_f=512))
    assert jnp.array_equal(out0_d, x), "mismatch vs reference (donated, flag=0)"

    print("KERNEL_OK")
</pallas_src>

<mosaic_0001>
module attributes {stable_mosaic.version = 11 : i64} {
  func.func @_affine_tanh_kernel(%arg0: i32, %arg1: i32, %arg2: memref<2x512xf32, #tpu.memory_space<vmem>>, %arg3: memref<1x512xf32, #tpu.memory_space<vmem>>, %arg4: memref<1x512xf32, #tpu.memory_space<vmem>>, %arg5: memref<2x512xf32, #tpu.memory_space<vmem>>) attributes {dimension_semantics = [#tpu.dimension_semantics<parallel>, #tpu.dimension_semantics<parallel>], iteration_bounds = array<i64: 1, 2>, scalar_prefetch = 0 : i64, scratch_operands = 0 : i64, tpu.core_type = #tpu.core_type<tc>, window_params = [{transform_indices = @transform_0, window_bounds = array<i64: 2, 512>}, {transform_indices = @transform_1, window_bounds = array<i64: 1, 512>}, {transform_indices = @transform_2, window_bounds = array<i64: 1, 512>}, {transform_indices = @transform_3, window_bounds = array<i64: 2, 512>}]} {
    %c0 = arith.constant 0 : index
    %c0_0 = arith.constant 0 : index
    %0 = vector.load %arg2[%c0, %c0_0] : memref<2x512xf32, #tpu.memory_space<vmem>>, vector<2x512xf32>
    %c0_1 = arith.constant 0 : index
    %c0_2 = arith.constant 0 : index
    %1 = vector.load %arg3[%c0_1, %c0_2] : memref<1x512xf32, #tpu.memory_space<vmem>>, vector<1x512xf32>
    %2 = vector.broadcast %1 : vector<1x512xf32> to vector<2x512xf32>
    %3 = arith.mulf %0, %2 : vector<2x512xf32>
    %c0_3 = arith.constant 0 : index
    %c0_4 = arith.constant 0 : index
    %4 = vector.load %arg4[%c0_3, %c0_4] : memref<1x512xf32, #tpu.memory_space<vmem>>, vector<1x512xf32>
    %5 = vector.broadcast %4 : vector<1x512xf32> to vector<2x512xf32>
    %6 = arith.addf %3, %5 : vector<2x512xf32>
    %7 = math.tanh %6 : vector<2x512xf32>
    %c0_5 = arith.constant 0 : index
    %c0_6 = arith.constant 0 : index
    %8 = vector.load %arg5[%c0_5, %c0_6] : memref<2x512xf32, #tpu.memory_space<vmem>>, vector<2x512xf32>
    tpu.vector_store %arg5[%c0_5, %c0_6], %7 {strides = array<i32>} : memref<2x512xf32, #tpu.memory_space<vmem>>, vector<2x512xf32>,
    return
  }
  func.func @transform_0(%arg0: i32, %arg1: i32) -> (i32, i32) {
    %c0_i32 = arith.constant 0 : i32
    return %arg0, %arg1 : i32, i32
  }
  func.func @transform_1(%arg0: i32, %arg1: i32) -> (i32, i32) {
    %c0_i32 = arith.constant 0 : i32
    %c0_i32_0 = arith.constant 0 : i32
    return %c0_i32, %arg1 : i32, i32
  }
  func.func @transform_2(%arg0: i32, %arg1: i32) -> (i32, i32) {
    %c0_i32 = arith.constant 0 : i32
    %c0_i32_0 = arith.constant 0 : i32
    return %c0_i32, %arg1 : i32, i32
  }
  func.func @transform_3(%arg0: i32, %arg1: i32) -> (i32, i32) {
    %c0_i32 = arith.constant 0 : i32
    return %arg0, %arg1 : i32, i32
  }
}

</mosaic_0001>

<bundles_post_ra>
// kernel: branch_1_fun.1
= control target key start
LH: loop header
LB: loop body
LE: loop exit
PB: predicated region body
PF: predicated region fallthrough
CT: control target
= control target key end

     0   :  { %s470_s12 = smov 0   ;;  %s472_s13 = smov 0   ;;  %s522_s0 = inlined_call_operand.vmem [shape: f32[2,1024], index: 0, kind: input, shape index: {}]   ;;  %s523_s1 = inlined_call_operand.vmem [shape: f32[1,1024], index: 1, kind: input, shape index: {}]   ;;  %s524_s2 = inlined_call_operand.vmem [shape: f32[1,1024], index: 2, kind: input, shape index: {}]   ;;  %s525_s3 = inlined_call_operand.vmem [shape: f32[2,1024], index: 3, kind: output, shape index: {}]  }
   0x1   :  { %s474_s14 = smov 0  }
   0x2 LB: > { %s22_s15 = sadd.s32 1, %s444_s13  ;;  %p391_p0 = scmp.ge.s32.totalorder %s448_s14, 1  ;;  %s448_s14 = sphi %s474_s14, %s13_s14   ;;  %s444_s13 = sphi %s472_s13, %s527_s13   ;;  %s440_s12 = sphi %s470_s12, %s526_s12  }
   0x3   : > { %p23_p1 = scmp.ge.s32.totalorder %s22_s15, 2  ;;  %p178_p2 = scmp.lt.s32.totalorder %s448_s14, 3 }
   0x5   : > { %s529_s15 = smov (%p23_p1, %s22_s15), 0  ;;  %p179_p3 = pnand %p391_p0, %p178_p2 }
   0x6   : > { %s392_s16 = sshll.u32 (!%p179_p3), %s440_s12, 2 }
   0x7   : > { %182 = sbr.rel (%p179_p3) target bundleno = 33 (0x21), region = 32  ;;  %p221_p4 = scmp.lt.s32.totalorder (!%p179_p3), %s392_s16, 7 }
   0xc   : > { %s531_s16 = smov (!%p221_p4, %s392_s16), 7  ;;  %vm258_vm0 = vcmask 1041408   ;;  %vm260_vm1 = vcmask 1045508   ;;  %vm262_vm2 = vcmask 1043456  }
   0xd   : > { %s393_s17 = sshll.u32 %s531_s16, 1  ;;  %s231_s20 = scalar_lea.vmem %s523_s1, %s531_s16 }
   0xe   : > { %s236_s23 = scalar_lea.vmem %s524_s2, %s531_s16  ;;  %v249_v0 = vld [vmem:[%s231_s20] sm:$0xf]  ;;  %s226_s26 = scalar_lea.vmem %s522_s0, %s393_s17 }
   0xf   : > { %v251_v1 = vperm.slane %v249_v0, 0  ;;  %v252_v2 = vperm.slane %v249_v0, 1  ;;  %v253_v3 = vperm.slane %v249_v0, 2  ;;  %v254_v4 = vperm.slane %v249_v0, 3  ;;  %v266_v5 = vld [vmem:[%s236_s23] sm:$0xf]  ;;  %s246_s29 = scalar_lea.vmem %s525_s3, %s393_s17 }
  0x10   : > { %v248_v9 = vld [vmem:[%s226_s26] sm:$0xff]  ;;  %v268_v10 = vperm.slane %v266_v5, 0  ;;  %v269_v11 = vperm.slane %v266_v5, 1  ;;  %v270_v12 = vperm.slane %v266_v5, 2  ;;  %v271_v13 = vperm.slane %v266_v5, 3 }
  0x11   : > { %v255_v6 = vrot.slane %v252_v2, 6  ;;  %v256_v7 = vrot.slane %v253_v3, 4  ;;  %v257_v8 = vrot.slane %v254_v4, 2 }
  0x12   : > { %v272_v17 = vrot.slane %v269_v11, 6  ;;  %v273_v18 = vrot.slane %v270_v12, 4  ;;  %v274_v19 = vrot.slane %v271_v13, 2 }
  0x13   : > { %v259_v14 = vsel %vm258_vm0, %v251_v1, %v255_v6  ;;  %v261_v15 = vsel %vm260_vm1, %v256_v7, %v257_v8 }
  0x14   : > { %v263_v16 = vsel %vm262_vm2, %v259_v14, %v261_v15  ;;  %v275_v21 = vsel %vm258_vm0, %v268_v10, %v272_v17  ;;  %v276_v22 = vsel %vm260_vm1, %v273_v18, %v274_v19 }
  0x15   : > { %v265_v20 = vmul.f32 %v263_v16, %v248_v9  ;;  %v277_v23 = vsel %vm262_vm2, %v275_v21, %v276_v22 }
  0x17   : > { %v279_v24 = vadd.f32 %v277_v23, %v265_v20 }
  0x19   : > { %424 = vtanh.f32 %v279_v24 }
  0x1f   : > { %v425_v25 = vpop.eup %424 }
  0x20   : > { %281 = vst [vmem:[%s246_s29] sm:$0xff] %v425_v25 }
  0x21 PF: > { %s13_s14 = sadd.s32 1, %s448_s14   ;;  %s526_s12 = smov %s444_s13 }
  0x22   : > { %p10_p5 = scmp.ge.s32.totalorder %s13_s14, 4   ;;  %s527_s13 = smov %s529_s15 }
  0x24   :  { %12 = sbr.rel (!%p10_p5) target bundleno = 2 (0x2), region = 68 }

</bundles_post_ra>
